<compile_context>
chip_gen: v7x
topology: tpu7x:2x2x1
jax: 0.10.0
libtpu: 0.0.40
codegen_flags: <defaults>
</compile_context>

<pallas_src>
import functools

import jax
import jax.numpy as jnp
from jax.experimental import pallas as pl
from jax.experimental.pallas import tpu as pltpu


def _round_up(x, m):
    return ((x + m - 1) // m) * m


_FUSED_DATA_BUDGET = 32 * 1024 * 1024   # estimate gate for the strip-resident path
_FUSED_VMEM_LIMIT = 48 * 1024 * 1024    # safe on v5e/v6e (128 MiB) and v7x (64 MiB)
_TWOPASS_VMEM_LIMIT = 32 * 1024 * 1024


def _sublane_multiple(dtype):
    # 32-bit -> 8 sublanes, 16-bit -> 16, 8-bit -> 32 (packing-friendly tiles)
    return max(8, 32 // jnp.dtype(dtype).itemsize)


def _feature_tile_candidates(D):
    if D % 128 == 0:
        return [c for c in (512, 256, 128) if D % c == 0]
    # Full-dim feature block: no padding needed, (8,128) rule waived for
    # full-extent dims.  (Output stores are masked, but only for narrow D.)
    return [D]


def _fused_bytes(n, td, in_item, out_item):
    io = n * td * 2 * (in_item + out_item)   # double-buffered input + output
    temps = 3 * n * td * 4                   # f32 working copies inside the kernel
    return io + temps


# ---------------------------------------------------------------------------
# Fused single-pass kernel: whole (N, td) feature strip resident in VMEM.
# ---------------------------------------------------------------------------
def _bn_fused_kernel(x_ref, gamma_ref, beta_ref, o_ref, *, eps, n_rows):
    x = x_ref[...].astype(jnp.float32)                      # (N, td)
    inv_n = 1.0 / n_rows
    mean = jnp.sum(x, axis=0, keepdims=True) * inv_n        # (1, td)
    xc = x - mean
    var = jnp.sum(xc * xc, axis=0, keepdims=True) * inv_n   # biased (BN training)
    a = gamma_ref[...].astype(jnp.float32) * jax.lax.rsqrt(var + eps)
    b = beta_ref[...].astype(jnp.float32)
    o_ref[...] = (xc * a + b).astype(o_ref.dtype)


# ---------------------------------------------------------------------------
# Two-pass fallback (large N): pass 1 = statistics -> fused coefficients
# ---------------------------------------------------------------------------
def _bn_stats_kernel(x_ref, gamma_ref, beta_ref, a_ref, b_ref,
                     sum_ref, sumsq_ref, *, eps, n_rows, tn, mask_rows):
    i = pl.program_id(1)  # batch (reduction) axis

    @pl.when(i == 0)
    def _():
        sum_ref[...] = jnp.zeros_like(sum_ref)
        sumsq_ref[...] = jnp.zeros_like(sumsq_ref)

    x = x_ref[...].astype(jnp.float32)                      # (tn, td)
    if mask_rows:
        # Last batch block may overhang the true N rows; zero them instead of
        # padding the batch axis up to a full tile in HBM.
        row = jax.lax.broadcasted_iota(jnp.int32, x.shape, 0) + i * tn
        x = jnp.where(row < n_rows, x, 0.0)
    sum_ref[...] += jnp.sum(x, axis=0, keepdims=True)
    sumsq_ref[...] += jnp.sum(x * x, axis=0, keepdims=True)

    @pl.when(i == pl.num_programs(1) - 1)
    def _():
        inv_n = 1.0 / n_rows
        mean = sum_ref[...] * inv_n
        # TODO(synk): E[x^2]-E[x]^2 can lose precision when |mean| >> std;
        # only reached for strips too large for the fused (centered) path.
        var = jnp.maximum(sumsq_ref[...] * inv_n - mean * mean, 0.0)
        a = gamma_ref[...].astype(jnp.float32) * jax.lax.rsqrt(var + eps)
        a_ref[...] = a
        b_ref[...] = beta_ref[...].astype(jnp.float32) - mean * a


def _bn_apply_kernel(x_ref, a_ref, b_ref, o_ref):
    x = x_ref[...].astype(jnp.float32)
    o_ref[...] = (x * a_ref[...] + b_ref[...]).astype(o_ref.dtype)


def batchnorm1d_pallas(x, gamma, beta, eps=1e-5, *, force_two_pass=False):
    """BatchNorm1d forward (training-mode statistics) via Pallas TPU kernels."""
    N, D = x.shape
    g2 = gamma.reshape(1, D)
    b2 = beta.reshape(1, D)
    in_item = jnp.dtype(x.dtype).itemsize
    out_item = in_item
    candidates = _feature_tile_candidates(D)

    # ---- fused single-pass path (x read from HBM once) --------------------
    if not force_two_pass:
        for td in candidates:
            if _fused_bytes(N, td, in_item, out_item) > _FUSED_DATA_BUDGET:
                continue
            nf = D // td
            return pl.pallas_call(
                functools.partial(_bn_fused_kernel, eps=float(eps), n_rows=N),
                out_shape=jax.ShapeDtypeStruct((N, D), x.dtype),
                grid_spec=pltpu.PrefetchScalarGridSpec(
                    num_scalar_prefetch=0,
                    grid=(nf,),
                    in_specs=[
                        pl.BlockSpec((N, td), lambda j: (0, j)),   # x strip
                        pl.BlockSpec((1, td), lambda j: (0, j)),   # gamma
                        pl.BlockSpec((1, td), lambda j: (0, j)),   # beta
                    ],
                    out_specs=pl.BlockSpec((N, td), lambda j: (0, j)),
                ),
                compiler_params=pltpu.CompilerParams(
                    dimension_semantics=("parallel",),
                    vmem_limit_bytes=_FUSED_VMEM_LIMIT,
                ),
            )(x, g2, b2)

    # ---- two-pass fallback for large N -------------------------------------
    td = candidates[0]
    sub = _sublane_multiple(x.dtype)
    target = max(sub, (2 * 1024 * 1024) // (td * 4))     # ~2 MiB f32-equiv block
    tn = max(sub, min(2048, (target // sub) * sub))
    tn = min(tn, _round_up(N, sub))
    n_feat = D // td
    n_batch = pl.cdiv(N, tn)
    grid = (n_feat, n_batch)
    mask_rows = (N % tn) != 0

    # Pass 1: per-feature statistics -> fused coefficients a, b
    a_coef, b_coef = pl.pallas_call(
        functools.partial(_bn_stats_kernel, eps=float(eps), n_rows=N,
                          tn=tn, mask_rows=mask_rows),
        out_shape=(
            jax.ShapeDtypeStruct((1, D), jnp.float32),
            jax.ShapeDtypeStruct((1, D), jnp.float32),
        ),
        grid_spec=pltpu.PrefetchScalarGridSpec(
            num_scalar_prefetch=0,
            grid=grid,
            in_specs=[
                pl.BlockSpec((tn, td), lambda j, i: (i, j)),   # x
                pl.BlockSpec((1, td), lambda j, i: (0, j)),    # gamma
                pl.BlockSpec((1, td), lambda j, i: (0, j)),    # beta
            ],
            out_specs=[
                pl.BlockSpec((1, td), lambda j, i: (0, j)),    # a
                pl.BlockSpec((1, td), lambda j, i: (0, j)),    # b
            ],
            scratch_shapes=[
                pltpu.VMEM((1, td), jnp.float32),              # running sum
                pltpu.VMEM((1, td), jnp.float32),              # running sum of squares
            ],
        ),
        compiler_params=pltpu.CompilerParams(
            dimension_semantics=("parallel", "arbitrary"),
            vmem_limit_bytes=_TWOPASS_VMEM_LIMIT,
        ),
    )(x, g2, b2)

    # Pass 2: y = x * a + b  (output written at its exact (N, D) shape)
    y = pl.pallas_call(
        _bn_apply_kernel,
        out_shape=jax.ShapeDtypeStruct((N, D), x.dtype),
        grid_spec=pltpu.PrefetchScalarGridSpec(
            num_scalar_prefetch=0,
            grid=grid,
            in_specs=[
                pl.BlockSpec((tn, td), lambda j, i: (i, j)),   # x
                pl.BlockSpec((1, td), lambda j, i: (0, j)),    # a
                pl.BlockSpec((1, td), lambda j, i: (0, j)),    # b
            ],
            out_specs=pl.BlockSpec((tn, td), lambda j, i: (i, j)),
        ),
        compiler_params=pltpu.CompilerParams(
            dimension_semantics=("parallel", "parallel"),
            vmem_limit_bytes=_TWOPASS_VMEM_LIMIT,
        ),
    )(x, a_coef, b_coef)

    return y


def batchnorm1d_ref(x, gamma, beta, eps=1e-5):
    xf = x.astype(jnp.float32)
    mean = jnp.mean(xf, axis=0, keepdims=True)
    var = jnp.mean((xf - mean) ** 2, axis=0, keepdims=True)  # biased, BN training
    y = (xf - mean) * jax.lax.rsqrt(var + eps) * gamma.reshape(1, -1) + beta.reshape(1, -1)
    return y.astype(x.dtype)


def _check(x, gamma, beta, **kw):
    out = jax.block_until_ready(batchnorm1d_pallas(x, gamma, beta, **kw))
    ref = batchnorm1d_ref(x, gamma, beta)
    assert out.shape == x.shape
    assert jnp.allclose(out, ref, atol=1e-4, rtol=1e-4), "mismatch vs reference"
    return out


if __name__ == "__main__":
    key = jax.random.PRNGKey(0)

    # Normalize(dim=32, norm='batch') -> BatchNorm1d(32); the BGRL-sized case.
    batch, dim = 8, 32
    kx, kg, kb, k2, k3 = jax.random.split(key, 5)
    x = jax.random.normal(kx, (batch, dim), dtype=jnp.float32)
    gamma = jnp.ones((dim,), jnp.float32) + 0.1 * jax.random.normal(kg, (dim,), jnp.float32)
    beta = 0.1 * jax.random.normal(kb, (dim,), jnp.float32)
    _check(x, gamma, beta)                                   # fused, full-D block

    # Lane-dense fused path (D multiple of 128).
    x2 = jax.random.normal(k2, (64, 256), dtype=jnp.float32)
    g2 = jnp.ones((256,), jnp.float32)
    b2_ = jnp.zeros((256,), jnp.float32)
    _check(x2, g2, b2_)                                      # fused, td=256

    # Two-pass fallback path (forced), including partial last batch block.
    x3 = jax.random.normal(k3, (300, 256), dtype=jnp.float32) + 0.5
    _check(x3, g2, b2_, force_two_pass=True)

    # TODO(synk): BatchNorm1d's running_mean/running_var buffer updates (a
    # training-time side effect that does not affect this forward output) and
    # eval-mode normalization from running stats are not reproduced.
    print("KERNEL_OK")
</pallas_src>

<mosaic_0001>
module attributes {stable_mosaic.version = 11 : i64} {
  func.func @_bn_fused_kernel(%arg0: i32, %arg1: memref<8x32xf32, #tpu.memory_space<vmem>>, %arg2: memref<1x32xf32, #tpu.memory_space<vmem>>, %arg3: memref<1x32xf32, #tpu.memory_space<vmem>>, %arg4: memref<8x32xf32, #tpu.memory_space<vmem>>) attributes {dimension_semantics = [#tpu.dimension_semantics<parallel>], iteration_bounds = array<i64: 1>, scalar_prefetch = 0 : i64, scratch_operands = 0 : i64, tpu.core_type = #tpu.core_type<tc>, window_params = [{transform_indices = @transform_0, window_bounds = array<i64: 8, 32>}, {transform_indices = @transform_1, window_bounds = array<i64: 1, 32>}, {transform_indices = @transform_2, window_bounds = array<i64: 1, 32>}, {transform_indices = @transform_3, window_bounds = array<i64: 8, 32>}]} {
    %c0 = arith.constant 0 : index
    %c0_0 = arith.constant 0 : index
    %0 = vector.load %arg1[%c0, %c0_0] : memref<8x32xf32, #tpu.memory_space<vmem>>, vector<8x32xf32>
    %cst = arith.constant dense<0.000000e+00> : vector<32xf32>
    %1 = vector.multi_reduction <add>, %0, %cst [0] : vector<8x32xf32> to vector<32xf32>
    %2 = vector.shape_cast %1 : vector<32xf32> to vector<1x32xf32>
    %cst_1 = arith.constant 1.250000e-01 : f32
    %3 = vector.broadcast %cst_1 : f32 to vector<1x32xf32>
    %4 = arith.mulf %2, %3 : vector<1x32xf32>
    %5 = vector.broadcast %4 : vector<1x32xf32> to vector<8x32xf32>
    %6 = arith.subf %0, %5 : vector<8x32xf32>
    %7 = arith.mulf %6, %6 : vector<8x32xf32>
    %cst_2 = arith.constant dense<0.000000e+00> : vector<32xf32>
    %8 = vector.multi_reduction <add>, %7, %cst_2 [0] : vector<8x32xf32> to vector<32xf32>
    %9 = vector.shape_cast %8 : vector<32xf32> to vector<1x32xf32>
    %cst_3 = arith.constant 1.250000e-01 : f32
    %10 = vector.broadcast %cst_3 : f32 to vector<1x32xf32>
    %11 = arith.mulf %9, %10 : vector<1x32xf32>
    %c0_4 = arith.constant 0 : index
    %c0_5 = arith.constant 0 : index
    %12 = vector.load %arg2[%c0_4, %c0_5] : memref<1x32xf32, #tpu.memory_space<vmem>>, vector<1x32xf32>
    %cst_6 = arith.constant 9.99999974E-6 : f32
    %13 = vector.broadcast %cst_6 : f32 to vector<1x32xf32>
    %14 = arith.addf %11, %13 : vector<1x32xf32>
    %15 = math.rsqrt %14 : vector<1x32xf32>
    %16 = arith.mulf %12, %15 : vector<1x32xf32>
    %c0_7 = arith.constant 0 : index
    %c0_8 = arith.constant 0 : index
    %17 = vector.load %arg3[%c0_7, %c0_8] : memref<1x32xf32, #tpu.memory_space<vmem>>, vector<1x32xf32>
    %18 = vector.broadcast %16 : vector<1x32xf32> to vector<8x32xf32>
    %19 = arith.mulf %6, %18 : vector<8x32xf32>
    %20 = vector.broadcast %17 : vector<1x32xf32> to vector<8x32xf32>
    %21 = arith.addf %19, %20 : vector<8x32xf32>
    %c0_9 = arith.constant 0 : index
    %c0_10 = arith.constant 0 : index
    %22 = vector.load %arg4[%c0_9, %c0_10] : memref<8x32xf32, #tpu.memory_space<vmem>>, vector<8x32xf32>
    tpu.vector_store %arg4[%c0_9, %c0_10], %21 {strides = array<i32>} : memref<8x32xf32, #tpu.memory_space<vmem>>, vector<8x32xf32>,
    return
  }
  func.func @transform_0(%arg0: i32) -> (i32, i32) {
    %c0_i32 = arith.constant 0 : i32
    %c0_i32_0 = arith.constant 0 : i32
    return %c0_i32, %arg0 : i32, i32
  }
  func.func @transform_1(%arg0: i32) -> (i32, i32) {
    %c0_i32 = arith.constant 0 : i32
    %c0_i32_0 = arith.constant 0 : i32
    return %c0_i32, %arg0 : i32, i32
  }
  func.func @transform_2(%arg0: i32) -> (i32, i32) {
    %c0_i32 = arith.constant 0 : i32
    %c0_i32_0 = arith.constant 0 : i32
    return %c0_i32, %arg0 : i32, i32
  }
  func.func @transform_3(%arg0: i32) -> (i32, i32) {
    %c0_i32 = arith.constant 0 : i32
    %c0_i32_0 = arith.constant 0 : i32
    return %c0_i32, %arg0 : i32, i32
  }
}

</mosaic_0001>

<bundles_post_ra>
// kernel: tpu_custom_call.1
= control target key start
LH: loop header
LB: loop body
LE: loop exit
PB: predicated region body
PF: predicated region fallthrough
CT: control target
= control target key end

     0   :  { %8 = vsyncpa [#allocation3], 0  ;;  %s190_s0 = inlined_call_operand.hbm [shape: f32[8,32], index: 0, kind: input, shape index: {}]   ;;  %s191_s1 = inlined_call_operand.vmem [shape: f32[1,32], index: 1, kind: input, shape index: {}]   ;;  %s192_s2 = inlined_call_operand.vmem [shape: f32[1,32], index: 2, kind: input, shape index: {}]   ;;  %s193_s3 = inlined_call_operand.hbm [shape: f32[8,32], index: 3, kind: output, shape index: {}]  }
   0x1   :  { %9 = vsyncpa [#allocation4], 0  ;;  %s135_s12 = smov [#allocation2]   ;;  %s87_s16 = scalar_lea.hbm %s190_s0, 128 }
   0x2   :  { %s16_s13 = sshll.u32 %s135_s12, 4  ;;  %p88_p0 = scmp.ne.s32.totalorder %s190_s0, %s87_s16  ;;  %s17_s13 = int_to_ptr.vmem [resolvable:$true] %s16_s13 }
   0x3   :  { %p91_p1 = scmp.lt.u32.totalorder %s87_s16, %s190_s0 }
   0x5   :  { %p93_p2 = pnand %p91_p1, %p88_p0 }
   0x7   :  { %96 = shalt.err (!%p93_p2)
}
   0x8   :  { %s97_s21 = scalar_lea.vmem %s17_s13, 128  ;;  %p102_p4 = scmp.lt.s32.totalorder %s17_s13, %s17_s13 }
   0x9   :  { %p98_p3 = scmp.ne.s32.totalorder %s17_s13, %s97_s21  ;;  %p103_p5 = scmp.lt.s32.totalorder %s97_s21, %s97_s21 }
   0xb   :  { %p104_p6 = por %p103_p5, %p102_p4 }
   0xd   :  { %p105_p7 = pnand %p104_p6, %p98_p3 }
   0xf   :  { %108 = shalt.err (!%p105_p7)
}
  0x10   :  { %19 = dma.hbm_to_vmem [thread:$0]  %s190_s0, 128, %s17_s13, [#allocation3]  }
  0x11   :  { %131 = dma.done.wait [#allocation3], 128  }
  0x12   :  { %132 = vsyncadd [#allocation3], 4294967168  ;;  %vm28_vm0 = vcmask 261120   ;;  %v27_v0 = vld [vmem:[#allocation2] sm:$0xff]  ;;  %v53_v20 = vlaneseq  ;;  %s136_s27 = smov [#allocation5]  }
  0x13   :  { %v29_v1 = vsel %vm28_vm0, %v27_v0, 0.0  ;;  %v47_v22 = vld [vmem:[%s191_s1] sm:$0x1]  ;;  %s73_s28 = sshll.u32 %s136_s27, 4  ;;  %s74_s28 = int_to_ptr.vmem [resolvable:$true] %s73_s28 }
  0x14   :  { %v30_v2 = vrot.slane %v29_v1, 4  ;;  %v54_v21 = vshrl.u32 %v53_v20, 7  ;;  %v82_v27 = vld [vmem:[%s192_s2] ss:$0 sm:$0xff]  ;;  %s109_s29 = scalar_lea.vmem %s74_s28, 128  ;;  %p114_p9 = scmp.lt.s32.totalorder %s74_s28, %s74_s28 }
  0x15   :  { %p110_p8 = scmp.ne.s32.totalorder %s74_s28, %s109_s29  ;;  %p115_p10 = scmp.lt.s32.totalorder %s109_s29, %s109_s29 }
  0x16   :  { %v31_v3 = vadd.f32 %v30_v2, %v29_v1  ;;  %v55_v23 = vsub.s32 0, %v54_v21 }
  0x17   :  { %p116_p11 = por %p115_p10, %p114_p9 }
  0x18   :  { %v32_v4 = vrot.slane %v31_v3, 2 }
  0x19   :  { %p117_p12 = pnand %p116_p11, %p110_p8 }
  0x1a   :  { %v33_v5 = vadd.f32 %v32_v4, %v31_v3 }
  0x1c   :  { %v34_v6 = vrot.slane %v33_v5, 1 }
  0x1e   :  { %v35_v7 = vadd.f32 %v34_v6, %v33_v5 }
  0x20   :  { %v36_v8 = vmul.f32 0.125, %v35_v7 }
  0x22   :  { %v37_v9 = vsub.f32 %v27_v0, %v36_v8 }
  0x24   :  { %v38_v10 = vmul.f32 %v37_v9, %v37_v9 }
  0x26   :  { %v39_v11 = vsel %vm28_vm0, %v38_v10, 0.0 }
  0x27   :  { %v40_v12 = vrot.slane %v39_v11, 4 }
  0x29   :  { %v41_v13 = vadd.f32 %v40_v12, %v39_v11 }
  0x2b   :  { %v42_v14 = vrot.slane %v41_v13, 2 }
  0x2d   :  { %v43_v15 = vadd.f32 %v42_v14, %v41_v13 }
  0x2f   :  { %v44_v16 = vrot.slane %v43_v15, 1 }
  0x31   :  { %v45_v17 = vadd.f32 %v44_v16, %v43_v15 }
  0x33   :  { %v46_v18 = vmul.f32 0.125, %v45_v17 }
  0x35   :  { %v48_v19 = vadd.f32 1e-05, %v46_v18 }
  0x37   :  { %85 = vrsqrt.f32 %v48_v19 }
  0x41   :  { %v86_v24 = vpop.eup %85 }
  0x42   :  { %v50_v25 = vmul.f32 %v86_v24, %v47_v22 }
  0x44   :  { %v56_v26 = vrot.slane %v50_v25, %v55_v23 }
  0x46   :  { %v58_v28 = vmul.f32 %v56_v26, %v37_v9 }
  0x48   :  { %v65_v29 = vadd.f32 %v82_v27, %v58_v28 }
  0x4a   :  { %66 = vst.msk [vmem:[#allocation5] sm:$0xff] %vm28_vm0, %v65_v29 }
  0x4b   :  { %120 = shalt.err (!%p117_p12)
}
  0x4c   :  { %s121_s4 = scalar_lea.hbm %s193_s3, 128 }
  0x4d   :  { %p122_p13 = scmp.ne.s32.totalorder %s193_s3, %s121_s4  ;;  %p125_p0 = scmp.lt.u32.totalorder %s121_s4, %s193_s3 }
  0x4f   :  { %p127_p1 = pnand %p125_p0, %p122_p13 }
  0x51   :  { %130 = shalt.err (!%p127_p1)
}
  0x52   :  { %76 = dma.vmem_to_hbm [thread:$0]  %s74_s28, 128, %s193_s3, [#allocation4]  }
  0x53   :  { %133 = dma.done.wait [#allocation4], 128  }
  0x54   :  { %134 = vsyncadd [#allocation4], 4294967168 }
  0x55   :  { %80 = vsyncpa [#allocation3], 1 }
  0x56   :  { %81 = vsyncpa [#allocation4], 1 }

</bundles_post_ra>
